<compile_context>
chip_gen: v7x
topology: tpu7x:2x2x1
jax: 0.10.0
libtpu: 0.0.40
codegen_flags: <defaults>
</compile_context>

<pallas_src>
import numpy as np
import jax
import jax.numpy as jnp
from jax.experimental import pallas as pl
from jax.experimental.pallas import tpu as pltpu

_LANES = 128
_SUBLANES = 8
# ~2 MiB per block: 2 arrays x 2 pipeline buffers = 8 MiB VMEM -> safe on
# v5e (16 MiB default scoped), v6e and v7x, while making the ~0.35 us
# per-grid-step overhead negligible for an HBM-bandwidth-bound copy.
_TARGET_BLOCK_BYTES = 2 * 1024 * 1024
_VMEM_LIMIT_BYTES = 32 * 1024 * 1024  # valid on v5e/v6e/v7x


def _copy_kernel(x_ref, o_ref):
    # The only data-path "compute" of a view/reshape: move the tile.
    o_ref[...] = x_ref[...]


def _resolve_shape(numel, shape):
    """Mimic torch.Tensor.view shape resolution, including a single -1."""
    shape = tuple(int(s) for s in shape)
    if shape.count(-1) > 1:
        raise ValueError("only one dimension can be inferred")
    if -1 in shape:
        known = 1
        for s in shape:
            if s != -1:
                known *= s
        if known == 0 or numel % known != 0:
            raise ValueError(f"shape {shape} is invalid for input of size {numel}")
        shape = tuple(numel // known if s == -1 else s for s in shape)
    if int(np.prod(shape, dtype=np.int64)) != numel:
        raise ValueError(f"shape {shape} is invalid for input of size {numel}")
    return shape


def _pallas_copy(arr, block_shape):
    """Blocked identity copy over axis 0 of `arr` (1-D or 2-D)."""
    if len(block_shape) == 2:
        index_map = lambda i: (i, 0)
    else:
        index_map = lambda i: (i,)
    itemsize = np.dtype(arr.dtype).itemsize
    return pl.pallas_call(
        _copy_kernel,
        out_shape=jax.ShapeDtypeStruct(arr.shape, arr.dtype),
        grid=(pl.cdiv(arr.shape[0], block_shape[0]),),
        in_specs=[pl.BlockSpec(block_shape, index_map)],
        out_specs=pl.BlockSpec(block_shape, index_map),
        compiler_params=pltpu.CompilerParams(
            dimension_semantics=("parallel",),
            vmem_limit_bytes=_VMEM_LIMIT_BYTES),
        cost_estimate=pl.CostEstimate(
            flops=0,
            transcendentals=0,
            bytes_accessed=2 * int(arr.size) * itemsize),
    )(arr)


def view_forward(x, shape):
    """Pallas-backed equivalent of `View(shape)(x)` == `x.view(*shape)`."""
    # TODO(synk): torch .view errors on non-contiguous inputs; JAX arrays have
    # no stride/contiguity notion, so this behaves like .reshape on that axis.
    target = _resolve_shape(x.size, shape)
    n = int(x.size)
    if n == 0:
        return jnp.reshape(x, target)

    itemsize = np.dtype(x.dtype).itemsize
    pack = max(1, 4 // itemsize)          # f32 -> 1, bf16 -> 2, int8/fp8 -> 4
    sub_unit = _SUBLANES * pack           # native sublane tile rows for dtype

    # Metadata-only flatten (row-major, same element order as contiguous torch).
    flat = jnp.reshape(x, (-1,))

    # Widest lane-dense width that divides n exactly (no padding, no slicing).
    width = 0
    for w in (2048, 1024, 512, 256, _LANES):
        if n % w == 0:
            width = w
            break

    if width:
        rows = n // width
        row_bytes = width * itemsize
        block_rows = (_TARGET_BLOCK_BYTES // row_bytes) // sub_unit * sub_unit
        block_rows = max(sub_unit, block_rows)
        if block_rows >= rows:
            block_rows = rows             # full-extent block is always legal
        x2d = flat.reshape(rows, width)
        out = _pallas_copy(x2d, (block_rows, width))
    else:
        # Ragged total size (not a multiple of 128): 1-D blocked copy; the
        # out-of-bounds tail of the final block is masked by Pallas.
        block = pack * _SUBLANES * _LANES * 512   # ~2 MiB of elements
        if block >= n:
            block = n                     # single full-extent block
        out = _pallas_copy(flat, (block,))

    # Present the requested view shape (metadata-only reshape).
    return out.reshape(target)


if __name__ == "__main__":
    key = jax.random.PRNGKey(0)
    # Small NCHW-like input, consistent with typical use of View in the model:
    # flatten conv features per-sample -> View((batch, -1)).
    x = jax.random.normal(key, (2, 4, 16, 16), dtype=jnp.float32)

    view_shape = (2, -1)  # the shape argument the module would be built with
    out = view_forward(x, view_shape)
    out = jax.block_until_ready(out)

    # Reference: plain JAX reshape (exactly what torch .view does on a
    # contiguous tensor).
    ref = x.reshape(2, -1)
    assert out.shape == ref.shape, (out.shape, ref.shape)
    assert out.dtype == ref.dtype
    np.testing.assert_array_equal(np.asarray(out), np.asarray(ref))

    print("KERNEL_OK")
</pallas_src>

<mosaic_0001>
module attributes {stable_mosaic.version = 11 : i64} {
  func.func @_copy_kernel(%arg0: i32, %arg1: memref<1x2048xf32, #tpu.memory_space<vmem>>, %arg2: memref<1x2048xf32, #tpu.memory_space<vmem>>) attributes {dimension_semantics = [#tpu.dimension_semantics<parallel>], iteration_bounds = array<i64: 1>, scalar_prefetch = 0 : i64, scratch_operands = 0 : i64, tpu.core_type = #tpu.core_type<tc>, window_params = [{transform_indices = @transform_0, window_bounds = array<i64: 1, 2048>}, {transform_indices = @transform_1, window_bounds = array<i64: 1, 2048>}]} {
    %c0 = arith.constant 0 : index
    %c0_0 = arith.constant 0 : index
    %0 = vector.load %arg1[%c0, %c0_0] : memref<1x2048xf32, #tpu.memory_space<vmem>>, vector<1x2048xf32>
    %c0_1 = arith.constant 0 : index
    %c0_2 = arith.constant 0 : index
    %1 = vector.load %arg2[%c0_1, %c0_2] : memref<1x2048xf32, #tpu.memory_space<vmem>>, vector<1x2048xf32>
    tpu.vector_store %arg2[%c0_1, %c0_2], %0 {strides = array<i32>} : memref<1x2048xf32, #tpu.memory_space<vmem>>, vector<1x2048xf32>,
    return
  }
  func.func @transform_0(%arg0: i32) -> (i32, i32) {
    %c0_i32 = arith.constant 0 : i32
    %c0_i32_0 = arith.constant 0 : i32
    return %arg0, %c0_i32 : i32, i32
  }
  func.func @transform_1(%arg0: i32) -> (i32, i32) {
    %c0_i32 = arith.constant 0 : i32
    %c0_i32_0 = arith.constant 0 : i32
    return %arg0, %c0_i32 : i32, i32
  }
}

</mosaic_0001>

<bundles_post_ra>
// kernel: tpu_custom_call.1
= control target key start
LH: loop header
LB: loop body
LE: loop exit
PB: predicated region body
PF: predicated region fallthrough
CT: control target
= control target key end

     0   :  { %6 = vsyncpa [#allocation3], 0  ;;  %s126_s0 = inlined_call_operand.hbm [shape: f32[1,2048], index: 0, kind: input, shape index: {}]   ;;  %s127_s1 = inlined_call_operand.hbm [shape: f32[1,2048], index: 1, kind: output, shape index: {}]  }
   0x1   :  { %7 = vsyncpa [#allocation4], 0  ;;  %s90_s6 = smov [#allocation2]   ;;  %s42_s10 = scalar_lea.hbm %s126_s0, 256 }
   0x2   :  { %s14_s7 = sshll.u32 %s90_s6, 4  ;;  %p43_p0 = scmp.ne.s32.totalorder %s126_s0, %s42_s10  ;;  %s15_s7 = int_to_ptr.vmem [resolvable:$true] %s14_s7 }
   0x3   :  { %p46_p1 = scmp.lt.u32.totalorder %s42_s10, %s126_s0 }
   0x5   :  { %p48_p2 = pnand %p46_p1, %p43_p0 }
   0x7   :  { %51 = shalt.err (!%p48_p2)
}
   0x8   :  { %s52_s15 = scalar_lea.vmem %s15_s7, 256  ;;  %p57_p4 = scmp.lt.s32.totalorder %s15_s7, %s15_s7 }
   0x9   :  { %p53_p3 = scmp.ne.s32.totalorder %s15_s7, %s52_s15  ;;  %p58_p5 = scmp.lt.s32.totalorder %s52_s15, %s52_s15 }
   0xb   :  { %p59_p6 = por %p58_p5, %p57_p4 }
   0xd   :  { %p60_p7 = pnand %p59_p6, %p53_p3 }
   0xf   :  { %63 = shalt.err (!%p60_p7)
}
  0x10   :  { %17 = dma.hbm_to_vmem [thread:$0]  %s126_s0, 256, %s15_s7, [#allocation3]  }
  0x11   :  { %86 = dma.done.wait [#allocation3], 256  }
  0x12   :  { %87 = vsyncadd [#allocation3], 4294967040  ;;  %s91_s18 = smov [#allocation5]   ;;  %v21_v0 = vld [vmem:[#allocation2] sm:$0xff]  ;;  %v22_v1 = vld [vmem:[#allocation2 + $0x8] sm:$0xff] }
  0x13   :  { %s31_s19 = sshll.u32 %s91_s18, 4  ;;  %23 = vst [vmem:[#allocation5] sm:$0xff] %v21_v0  ;;  %24 = vst [vmem:[#allocation5 + $0x8] sm:$0xff] %v22_v1  ;;  %s32_s19 = int_to_ptr.vmem [resolvable:$true] %s31_s19 }
  0x14   :  { %s64_s20 = scalar_lea.vmem %s32_s19, 256  ;;  %p69_p9 = scmp.lt.s32.totalorder %s32_s19, %s32_s19 }
  0x15   :  { %p65_p8 = scmp.ne.s32.totalorder %s32_s19, %s64_s20  ;;  %p70_p10 = scmp.lt.s32.totalorder %s64_s20, %s64_s20 }
  0x17   :  { %p71_p11 = por %p70_p10, %p69_p9 }
  0x19   :  { %p72_p12 = pnand %p71_p11, %p65_p8 }
  0x1b   :  { %75 = shalt.err (!%p72_p12)
}
  0x1c   :  { %s76_s0 = scalar_lea.hbm %s127_s1, 256 }
  0x1d   :  { %p77_p13 = scmp.ne.s32.totalorder %s127_s1, %s76_s0  ;;  %p80_p0 = scmp.lt.u32.totalorder %s76_s0, %s127_s1 }
  0x1f   :  { %p82_p1 = pnand %p80_p0, %p77_p13 }
  0x21   :  { %85 = shalt.err (!%p82_p1)
}
  0x22   :  { %34 = dma.vmem_to_hbm [thread:$0]  %s32_s19, 256, %s127_s1, [#allocation4]  }
  0x23   :  { %88 = dma.done.wait [#allocation4], 256  }
  0x24   :  { %89 = vsyncadd [#allocation4], 4294967040 }
  0x25   :  { %38 = vsyncpa [#allocation3], 1 }
  0x26   :  { %39 = vsyncpa [#allocation4], 1 }

</bundles_post_ra>
